<compile_context>
chip_gen: v7x
topology: tpu7x:2x2x1
jax: 0.10.0
libtpu: 0.0.40
codegen_flags: <defaults>
</compile_context>

<pallas_src>
import functools
from math import sqrt

import jax
import jax.numpy as jnp
from jax import lax
from jax.experimental import pallas as pl
from jax.experimental.pallas import tpu as pltpu


_TM, _TN, _TK = 512, 512, 512          # projection matmul tiles (clamped to dims)
_TL = 256                              # MHA query-block tile (clamped to L)


@functools.lru_cache(maxsize=None)
def _vmem_limit_bytes():
    """Generation-aware scoped-VMEM budget (~70% of physical, with headroom)."""
    try:
        cap = int(getattr(pltpu.get_tpu_info(), "vmem_capacity_bytes",
                          64 * 1024 * 1024))
    except Exception:
        cap = 64 * 1024 * 1024
    return max(32 * 1024 * 1024, min(int(cap * 0.7), 96 * 1024 * 1024))


# ----------------------------- Tiled linear --------------------------------

def _linear_kernel(x_ref, w_ref, b_ref, o_ref, acc_ref):
    """One (tm, tn) output tile of  x @ w + b  with a K-reduction grid axis.

    x tile (tm, tk) and w tile (tk, tn) are bf16 -> bf16 MXU path; the
    accumulator is f32 in VMEM; bias add / final cast happen on the last K step.
    """

    @pl.when(pl.program_id(2) == 0)
    def _():
        acc_ref[...] = jnp.zeros_like(acc_ref)

    acc_ref[...] += jnp.dot(x_ref[...], w_ref[...],
                            preferred_element_type=jnp.float32)

    @pl.when(pl.program_id(2) == pl.num_programs(2) - 1)
    def _():
        o_ref[...] = (acc_ref[...] + b_ref[...]).astype(o_ref.dtype)


def linear(x, w, b, *, tm=_TM, tn=_TN, tk=_TK, out_dtype=None,
           compute_dtype=jnp.bfloat16):
    """x: (M, K); w: (K, N) pre-transposed layout; b: (N,)  ->  (M, N)."""
    M, K = x.shape
    K2, N = w.shape
    assert K == K2 and b.shape == (N,)
    out_dtype = out_dtype or x.dtype

    x = x.astype(compute_dtype)          # no-op if already bf16
    w = w.astype(compute_dtype)
    b2 = b.astype(jnp.float32).reshape(1, N)

    tm, tn, tk = min(tm, M), min(tn, N), min(tk, K)
    # Correctness: zero-pad a ragged K so the reduction never accumulates
    # out-of-bounds garbage.  (Partial M/N blocks only produce out-of-bounds
    # output elements, which Pallas discards on write-back.)
    if K % tk:
        pad = tk - (K % tk)
        x = jnp.pad(x, ((0, 0), (0, pad)))
        w = jnp.pad(w, ((0, pad), (0, 0)))
        K = K + pad

    grid = (pl.cdiv(M, tm), pl.cdiv(N, tn), K // tk)
    return pl.pallas_call(
        _linear_kernel,
        out_shape=jax.ShapeDtypeStruct((M, N), out_dtype),
        grid_spec=pltpu.PrefetchScalarGridSpec(
            num_scalar_prefetch=0,
            grid=grid,
            in_specs=[
                pl.BlockSpec((tm, tk), lambda i, j, k: (i, k)),   # activations
                pl.BlockSpec((tk, tn), lambda i, j, k: (k, j)),   # weights (K,N)
                pl.BlockSpec((1, tn), lambda i, j, k: (0, j)),    # bias (f32)
            ],
            out_specs=pl.BlockSpec((tm, tn), lambda i, j, k: (i, j)),
            scratch_shapes=[pltpu.VMEM((tm, tn), jnp.float32)],
        ),
        compiler_params=pltpu.CompilerParams(
            dimension_semantics=("parallel", "parallel", "arbitrary"),
            vmem_limit_bytes=_vmem_limit_bytes()),
    )(x, w, b2)


# --------------------------- Multi-head attention ---------------------------

def _mha_kernel(q_ref, k_ref, v_ref, o_ref, *, n_heads, d_k, d_v):
    # One (batch, L-tile): q (tL, H*dk) bf16, k (S, H*dk) bf16, v (S, H*dv) bf16.
    # Softmax scale is already folded into the Q projection weights.
    q = q_ref[...]
    k = k_ref[...]
    v = v_ref[...]
    outs = []
    for h in range(n_heads):                       # static unroll over heads
        qh = q[:, h * d_k:(h + 1) * d_k]
        kh = k[:, h * d_k:(h + 1) * d_k]
        vh = v[:, h * d_v:(h + 1) * d_v]
        # scores = qh @ kh.T  (bf16 MXU, f32 accumulation, no transpose pass).
        s = lax.dot_general(qh, kh, (((1,), (1,)), ((), ())),
                            preferred_element_type=jnp.float32)
        m = jnp.max(s, axis=-1, keepdims=True)     # f32 softmax (v5e-safe)
        p = jnp.exp(s - m)
        denom = jnp.sum(p, axis=-1, keepdims=True)
        r = pl.reciprocal(denom, approx=True)      # EUP slot (effectively free)
        r = r * (2.0 - denom * r)                  # one Newton step -> f32 accuracy
        a = (p * r).astype(vh.dtype)
        # Downcast each head's partial right away to cut vreg/VMEM pressure.
        outs.append(jnp.dot(a, vh, preferred_element_type=jnp.float32)
                    .astype(o_ref.dtype))
    # Single lane-dense store of the whole (tL, H*dv) block.
    o_ref[...] = jnp.concatenate(outs, axis=-1)
    # TODO(synk): flash-style tiling over S (extra "arbitrary" grid axis with
    # online softmax + VMEM m/l/acc scratch) once S outgrows a single VMEM block.


def multi_head_attention(q, k, v, n_heads, d_k, d_v, *, tl=_TL):
    """q: (B, L, H*dk), k: (B, S, H*dk), v: (B, S, H*dv) -> (B, L, H*dv)."""
    B, L, _ = q.shape
    S = k.shape[1]
    tl = min(tl, L)
    kern = functools.partial(_mha_kernel, n_heads=n_heads, d_k=d_k, d_v=d_v)
    sq = pl.Squeezed()
    return pl.pallas_call(
        kern,
        out_shape=jax.ShapeDtypeStruct((B, L, n_heads * d_v), q.dtype),
        grid=(B, pl.cdiv(L, tl)),
        in_specs=[
            pl.BlockSpec((sq, tl, n_heads * d_k), lambda b, l: (b, l, 0)),
            pl.BlockSpec((sq, S, n_heads * d_k), lambda b, l: (b, 0, 0)),
            pl.BlockSpec((sq, S, n_heads * d_v), lambda b, l: (b, 0, 0)),
        ],
        out_specs=pl.BlockSpec((sq, tl, n_heads * d_v), lambda b, l: (b, l, 0)),
        compiler_params=pltpu.CompilerParams(
            dimension_semantics=("parallel", "parallel"),
            vmem_limit_bytes=_vmem_limit_bytes()),
    )(q, k, v)


# ----------------------------- Module wrapper -------------------------------

class AttentionLayerPallas:
    def __init__(self, d_model, n_heads, d_keys=None, d_values=None, *, key,
                 param_dtype=jnp.bfloat16):
        d_keys = d_keys or d_model // n_heads
        d_values = d_values or d_model // n_heads
        self.d_model, self.n_heads = d_model, n_heads
        self.d_keys, self.d_values = d_keys, d_values

        def init_linear(k, out_features, in_features):
            kw, kb = jax.random.split(k)
            bound = 1.0 / sqrt(in_features)
            w = jax.random.uniform(kw, (out_features, in_features),
                                   jnp.float32, -bound, bound)
            b = jax.random.uniform(kb, (out_features,),
                                   jnp.float32, -bound, bound)
            return w, b

        k1, k2, k3, k4 = jax.random.split(key, 4)
        Wq, bq = init_linear(k1, d_keys * n_heads, d_model)
        Wk, bk = init_linear(k2, d_keys * n_heads, d_model)
        Wv, bv = init_linear(k3, d_values * n_heads, d_model)
        Wo, bo = init_linear(k4, d_model, d_values * n_heads)

        # Fold the softmax scale 1/sqrt(dk) into the Q projection (exact in
        # real arithmetic; removes H (L,S) VALU multiplies per block).
        scale = 1.0 / sqrt(d_keys)
        Wq, bq = Wq * scale, bq * scale

        # One-time host transpose to (in_features, out_features) so the kernel
        # contracts natural dims (no per-tile weight relayout), stored in bf16.
        self.Wq = jnp.asarray(Wq.T, param_dtype)
        self.Wk = jnp.asarray(Wk.T, param_dtype)
        self.Wv = jnp.asarray(Wv.T, param_dtype)
        self.Wo = jnp.asarray(Wo.T, param_dtype)
        self.bq = jnp.asarray(bq, jnp.float32)
        self.bk = jnp.asarray(bk, jnp.float32)
        self.bv = jnp.asarray(bv, jnp.float32)
        self.bo = jnp.asarray(bo, jnp.float32)

        # Fused QKV parameters for the self-attention fast path.
        self.Wqkv = jnp.concatenate([self.Wq, self.Wk, self.Wv], axis=1)
        self.bqkv = jnp.concatenate([self.bq, self.bk, self.bv])

    def __call__(self, queries, keys, values, attn_mask=None, tau=None, delta=None):
        B, L, _ = queries.shape
        _, S, _ = keys.shape
        H, dk, dv = self.n_heads, self.d_keys, self.d_values
        cd = jnp.bfloat16

        if queries is keys and keys is values:
            # iTransformer self-attention: one fused QKV projection -> the
            # activation is read from HBM once and only one grid is launched.
            x = queries.reshape(B * L, self.d_model).astype(cd)
            qkv = linear(x, self.Wqkv, self.bqkv, out_dtype=cd)
            q = qkv[:, :H * dk].reshape(B, L, H * dk)
            k = qkv[:, H * dk:2 * H * dk].reshape(B, S, H * dk)
            v = qkv[:, 2 * H * dk:].reshape(B, S, H * dv)
        else:
            q = linear(queries.reshape(B * L, self.d_model).astype(cd),
                       self.Wq, self.bq, out_dtype=cd).reshape(B, L, H * dk)
            k = linear(keys.reshape(B * S, self.d_model).astype(cd),
                       self.Wk, self.bk, out_dtype=cd).reshape(B, S, H * dk)
            v = linear(values.reshape(B * S, self.d_model).astype(cd),
                       self.Wv, self.bv, out_dtype=cd).reshape(B, S, H * dv)

        # Head split/merge happens inside the attention kernel -> no transpose
        # passes in the wrapper, only contiguous reshapes / lane slices.
        out = multi_head_attention(q, k, v, H, dk, dv)          # (B, L, H*dv) bf16

        out = linear(out.reshape(B * L, H * dv), self.Wo, self.bo,
                     out_dtype=jnp.float32)
        # TODO(synk): attn_mask / dropout / output_attention not exercised
        # (mask_flag=False, eval mode, output_attention=False) -> attn is None.
        return out.reshape(B, L, self.d_model), None


# ------------------------------- Reference ----------------------------------

def reference_forward(layer, queries, keys, values):
    """Pure-JAX reference mimicking the kernel's bf16-input / f32-accumulate
    numerics (softmax scale already folded into Wq/bq)."""
    hp = lax.Precision.HIGHEST
    cd = jnp.bfloat16
    B, L, _ = queries.shape
    S = keys.shape[1]
    H, dk, dv = layer.n_heads, layer.d_keys, layer.d_values

    def lin(x, w, b, out_dtype):
        y = jnp.dot(x.astype(cd).astype(jnp.float32), w.astype(jnp.float32),
                    precision=hp) + b.astype(jnp.float32)
        return y.astype(out_dtype)

    q = lin(queries.reshape(B * L, -1), layer.Wq, layer.bq, cd).reshape(B, L, H, dk)
    k = lin(keys.reshape(B * S, -1), layer.Wk, layer.bk, cd).reshape(B, S, H, dk)
    v = lin(values.reshape(B * S, -1), layer.Wv, layer.bv, cd).reshape(B, S, H, dv)
    s = jnp.einsum("blhe,bshe->bhls", q.astype(jnp.float32),
                   k.astype(jnp.float32), precision=hp)
    a = jax.nn.softmax(s, axis=-1)
    o = jnp.einsum("bhls,bshd->blhd", a.astype(cd).astype(jnp.float32),
                   v.astype(jnp.float32), precision=hp)
    o = o.astype(cd).reshape(B, L, H * dv)
    out = lin(o.reshape(B * L, -1), layer.Wo, layer.bo, jnp.float32)
    return out.reshape(B, L, layer.d_model)


# --------------------------------- Main --------------------------------------

if __name__ == "__main__":
    key = jax.random.PRNGKey(0)
    (k_layer, k_q, k_k, k_v, k_x, k_w, k_b, k_self) = jax.random.split(key, 8)
    hp = lax.Precision.HIGHEST

    # --- standalone check of the tiled linear: multi-tile M/N/K grid with an
    #     evenly dividing K and a ragged K (exercises the zero-pad path).
    for Mx, Kx, Nx in [(128, 512, 256), (128, 200, 256)]:
        xt = jax.random.normal(k_x, (Mx, Kx), jnp.float32)
        wt = jax.random.normal(k_w, (Kx, Nx), jnp.float32) * 0.05
        bt = jax.random.normal(k_b, (Nx,), jnp.float32)
        got = jax.block_until_ready(
            linear(xt, wt, bt, tm=64, tn=128, tk=128, out_dtype=jnp.float32))
        want = jnp.dot(xt.astype(jnp.bfloat16).astype(jnp.float32),
                       wt.astype(jnp.bfloat16).astype(jnp.float32),
                       precision=hp) + bt
        assert jnp.allclose(got, want, atol=2e-3, rtol=2e-3), "tiled linear mismatch"

    # --- full AttentionLayer forward at small shapes.
    B, L, S, d_model, n_heads = 2, 8, 8, 32, 4
    layer = AttentionLayerPallas(d_model, n_heads, key=k_layer)

    # (1) self-attention (queries is keys is values) -> fused QKV fast path.
    x_self = jax.random.normal(k_self, (B, L, d_model), jnp.float32)
    out_f, attn_f = layer(x_self, x_self, x_self, attn_mask=None)
    out_f = jax.block_until_ready(out_f)
    ref_f = reference_forward(layer, x_self, x_self, x_self)
    assert out_f.shape == (B, L, d_model) and attn_f is None
    assert jnp.allclose(out_f, ref_f, atol=2e-2, rtol=2e-2), "fused path mismatch"

    # (2) general cross-attention path with distinct q/k/v tensors.
    queries = jax.random.normal(k_q, (B, L, d_model), jnp.float32)
    keys_t = jax.random.normal(k_k, (B, S, d_model), jnp.float32)
    values_t = jax.random.normal(k_v, (B, S, d_model), jnp.float32)
    out, attn = layer(queries, keys_t, values_t, attn_mask=None)
    out = jax.block_until_ready(out)
    ref = reference_forward(layer, queries, keys_t, values_t)
    assert out.shape == (B, L, d_model) and attn is None
    assert jnp.allclose(out, ref, atol=2e-2, rtol=2e-2), "general path mismatch"

    print("KERNEL_OK")
</pallas_src>

<mosaic_0001>
module attributes {stable_mosaic.version = 11 : i64} {
  func.func @_linear_kernel(%arg0: i32, %arg1: i32, %arg2: i32, %arg3: memref<64x128xbf16, #tpu.memory_space<vmem>>, %arg4: memref<128x128xbf16, #tpu.memory_space<vmem>>, %arg5: memref<1x128xf32, #tpu.memory_space<vmem>>, %arg6: memref<64x128xf32, #tpu.memory_space<vmem>>, %arg7: memref<64x128xf32, #tpu.memory_space<vmem>>) attributes {dimension_semantics = [#tpu.dimension_semantics<parallel>, #tpu.dimension_semantics<parallel>, #tpu.dimension_semantics<arbitrary>], iteration_bounds = array<i64: 2, 2, 4>, scalar_prefetch = 0 : i64, scratch_operands = 1 : i64, tpu.core_type = #tpu.core_type<tc>, window_params = [{transform_indices = @transform_0, window_bounds = array<i64: 64, 128>}, {transform_indices = @transform_1, window_bounds = array<i64: 128, 128>}, {transform_indices = @transform_2, window_bounds = array<i64: 1, 128>}, {transform_indices = @transform_3, window_bounds = array<i64: 64, 128>}]} {
    %c0_i32 = arith.constant 0 : i32
    %0 = arith.cmpi eq, %arg2, %c0_i32 : i32
    %1 = arith.extui %0 : i1 to i32
    %c0_i32_0 = arith.constant 0 : i32
    %2 = arith.cmpi ne, %1, %c0_i32_0 : i32
    scf.if %2 {
      %cst_9 = arith.constant 0.000000e+00 : f32
      %12 = vector.broadcast %cst_9 : f32 to vector<64x128xf32>
      %c0_10 = arith.constant 0 : index
      %c0_11 = arith.constant 0 : index
      %13 = vector.load %arg7[%c0_10, %c0_11] : memref<64x128xf32, #tpu.memory_space<vmem>>, vector<64x128xf32>
      tpu.vector_store %arg7[%c0_10, %c0_11], %12 {strides = array<i32>} : memref<64x128xf32, #tpu.memory_space<vmem>>, vector<64x128xf32>,
    } else {
    }
    %c0 = arith.constant 0 : index
    %c0_1 = arith.constant 0 : index
    %3 = vector.load %arg7[%c0, %c0_1] : memref<64x128xf32, #tpu.memory_space<vmem>>, vector<64x128xf32>
    %c0_2 = arith.constant 0 : index
    %c0_3 = arith.constant 0 : index
    %4 = vector.load %arg3[%c0_2, %c0_3] : memref<64x128xbf16, #tpu.memory_space<vmem>>, vector<64x128xbf16>
    %c0_4 = arith.constant 0 : index
    %c0_5 = arith.constant 0 : index
    %5 = vector.load %arg4[%c0_4, %c0_5] : memref<128x128xbf16, #tpu.memory_space<vmem>>, vector<128x128xbf16>
    %cst = arith.constant dense<0.000000e+00> : vector<64x128xf32>
    %6 = tpu.matmul %4, %5, %cst {dimension_numbers = #tpu.dot_dimension_numbers<[1], [0], [0], [1], [0, 0, 1, 1], [], []>} : vector<64x128xbf16>, vector<128x128xbf16>, vector<64x128xf32> -> vector<64x128xf32>
    %7 = arith.addf %3, %6 : vector<64x128xf32>
    %c0_6 = arith.constant 0 : index
    %c0_7 = arith.constant 0 : index
    %8 = vector.load %arg7[%c0_6, %c0_7] : memref<64x128xf32, #tpu.memory_space<vmem>>, vector<64x128xf32>
    tpu.vector_store %arg7[%c0_6, %c0_7], %7 {strides = array<i32>} : memref<64x128xf32, #tpu.memory_space<vmem>>, vector<64x128xf32>,
    %c3_i32 = arith.constant 3 : i32
    %9 = arith.cmpi eq, %arg2, %c3_i32 : i32
    %10 = arith.extui %9 : i1 to i32
    %c0_i32_8 = arith.constant 0 : i32
    %11 = arith.cmpi ne, %10, %c0_i32_8 : i32
    scf.if %11 {
      %c0_9 = arith.constant 0 : index
      %c0_10 = arith.constant 0 : index
      %12 = vector.load %arg7[%c0_9, %c0_10] : memref<64x128xf32, #tpu.memory_space<vmem>>, vector<64x128xf32>
      %c0_11 = arith.constant 0 : index
      %c0_12 = arith.constant 0 : index
      %13 = vector.load %arg5[%c0_11, %c0_12] : memref<1x128xf32, #tpu.memory_space<vmem>>, vector<1x128xf32>
      %14 = vector.broadcast %13 : vector<1x128xf32> to vector<64x128xf32>
      %15 = arith.addf %12, %14 : vector<64x128xf32>
      %c0_13 = arith.constant 0 : index
      %c0_14 = arith.constant 0 : index
      %16 = vector.load %arg6[%c0_13, %c0_14] : memref<64x128xf32, #tpu.memory_space<vmem>>, vector<64x128xf32>
      tpu.vector_store %arg6[%c0_13, %c0_14], %15 {strides = array<i32>} : memref<64x128xf32, #tpu.memory_space<vmem>>, vector<64x128xf32>,
    } else {
    }
    return
  }
  func.func @transform_0(%arg0: i32, %arg1: i32, %arg2: i32) -> (i32, i32) {
    %c0_i32 = arith.constant 0 : i32
    return %arg0, %arg2 : i32, i32
  }
  func.func @transform_1(%arg0: i32, %arg1: i32, %arg2: i32) -> (i32, i32) {
    %c0_i32 = arith.constant 0 : i32
    return %arg2, %arg1 : i32, i32
  }
  func.func @transform_2(%arg0: i32, %arg1: i32, %arg2: i32) -> (i32, i32) {
    %c0_i32 = arith.constant 0 : i32
    %c0_i32_0 = arith.constant 0 : i32
    return %c0_i32, %arg1 : i32, i32
  }
  func.func @transform_3(%arg0: i32, %arg1: i32, %arg2: i32) -> (i32, i32) {
    %c0_i32 = arith.constant 0 : i32
    return %arg0, %arg1 : i32, i32
  }
}

</mosaic_0001>

<bundles_post_ra>
// kernel: tpu_custom_call.1
= control target key start
LH: loop header
LB: loop body
LE: loop exit
PB: predicated region body
PF: predicated region fallthrough
CT: control target
= control target key end

     0   :  { %s1602_s0 = inlined_call_operand.hbm [shape: bf16[128,512], index: 0, kind: input, shape index: {}]   ;;  %s1603_s1 = inlined_call_operand.hbm [shape: bf16[512,256], index: 1, kind: input, shape index: {}]   ;;  %s1604_s2 = inlined_call_operand.vmem [shape: f32[1,256], index: 2, kind: input, shape index: {}]   ;;  %s1605_s3 = inlined_call_operand.hbm [shape: f32[128,256], index: 3, kind: output, shape index: {}]  }
   0x1   :  { %1622 = sst [smem:[#allocation21_spill]] %s1602_s0 }
   0x2   :  { %1623 = sst [smem:[#allocation22_spill]] %s1604_s2 }
   0x3   :  { %1624 = sst [smem:[#allocation23_spill]] %s1605_s3 }
   0x4   :  { %8 = vsyncpa [#allocation4], 0 }
   0x5   :  { %10 = vsyncpa [#allocation4 + $0x1], 0 }
   0x6   :  { %11 = vsyncpa [#allocation7], 0 }
   0x7   :  { %13 = vsyncpa [#allocation7 + $0x1], 0 }
   0x8   :  { %14 = vsyncpa [#allocation5], 0 }
   0x9   :  { %16 = vsyncpa [#allocation5 + $0x1], 0  ;;  %s1170_s12 = smov 0   ;;  %s1172_s13 = smov 0  }
   0xa   :  { %s1174_s14 = smov 0   ;;  %s1176_s15 = smov 0  }
   0xb   :  { %s1178_s16 = smov 0   ;;  %s1180_s17 = smov 0  }
   0xc   :  { %s1182_s18 = smov 0   ;;  %s1184_s19 = smov 0  }
   0xd   :  { %s1186_s20 = smov 0   ;;  %s1188_s21 = smov 0  }
   0xe   :  { %s1190_s22 = smov 0   ;;  %s1192_s23 = smov 0  }
   0xf   :  { %s1194_s24 = smov 0   ;;  %s1196_s25 = smov 0  }
  0x10   :  { %s1198_s26 = smov 0   ;;  %s1200_s27 = smov 0  }
  0x11 LB: > { %1625 = sst [smem:[#allocation12_spill]] %s1113_s21  ;;  %s652_s28 = sadd.s32 4294967295, %s1137_s27   ;;  %s1137_s27 = sphi %s1200_s27, %s22_s27   ;;  %s1133_s26 = sphi %s1198_s26, %s1673_s26   ;;  %s1129_s25 = sphi %s1196_s25, %s1686_s25   ;;  %s1125_s24 = sphi %s1194_s24, %s1685_s24   ;;  %s1121_s23 = sphi %s1192_s23, %s1670_s23   ;;  %s1117_s22 = sphi %s1190_s22, %s1684_s22   ;;  %s1113_s21 = sphi %s1188_s21, %s1683_s21   ;;  %s1109_s20 = sphi %s1186_s20, %s1682_s20   ;;  %s1105_s19 = sphi %s1184_s19, %s1681_s19   ;;  %s1101_s18 = sphi %s1182_s18, %s1680_s18   ;;  %s1097_s17 = sphi %s1180_s17, %s1679_s17   ;;  %s1093_s16 = sphi %s1178_s16, %s1678_s16   ;;  %s1089_s15 = sphi %s1176_s15, %s1677_s15   ;;  %s1085_s14 = sphi %s1174_s14, %s1676_s14   ;;  %s1081_s13 = sphi %s1172_s13, %s1675_s13   ;;  %s1077_s12 = sphi %s1170_s12, %s1674_s12  }
  0x12   : > { %1626 = sst [smem:[#allocation13_spill]] %s1117_s22  ;;  %s34_s29 = sadd.s32 1, %s1125_s24 }
  0x13   : > { %1627 = sst [smem:[#allocation14_spill]] %s1121_s23  ;;  %p1250_p0 = scmp.ge.s32.totalorder %s34_s29, 4 }
  0x14   : > { %1628 = sst [smem:[#allocation15_spill]] %s1133_s26  ;;  %p57_p1 = scmp.ne.s32.totalorder %s1109_s20, %s1105_s19 }
  0x15   : > { %s1688_s29 = smov (%p1250_p0, %s34_s29), 0  ;;  %p1610_p2 = scmp.eq.s32.totalorder %s1137_s27, 0 }
  0x16   : > { %1630 = sst [smem:[#allocation16_spill]] %s1688_s29  ;;  %p63_p3 = scmp.ne.s32.totalorder %s1105_s19, %s1101_s18 }
  0x17   : > { %s1266_s6 = ssub.s32 %s1125_s24, %s1688_s29  ;;  %p1268_p4 = scmp.eq.s32.totalorder %s652_s28, 0 }
  0x18   : > { %p1274_p5 = por %p1610_p2, %p57_p1  ;;  %p1278_p6 = scmp.eq.s32.totalorder %s652_s28, 15 }
  0x19   : > { %s1631_s7 = scalar_select %p1268_p4, 1, 0 }
  0x1a   : > { %s1633_s9 = scalar_select %p1278_p6, 1, 0 }
  0x1b   : > { %p1284_p7 = por %p1268_p4, %p63_p3  ;;  %p1609_p8 = scmp.lt.s32.totalorder %s1137_s27, 16 }
  0x1c   : > { %s169_s11 = sand.u32 1, %s1109_s20   ;;  %s689_s5 = sshll.u32 %s1133_s26, 5 }
  0x1d   : > { %s1634_s10 = scalar_select %p1284_p7, 1, 0 }
  0x1e   : > { %s656_s18 = sshll.u32 %s169_s11, 5  ;;  %s179_s4 = sadd.s32 %s1125_s24, %s689_s5 }
  0x1f   : > { %s173_s29 = scalar_lea.vmem [#allocation3], %s656_s18  ;;  %s659_s23 = sshll.u32 %s179_s4, 6 }
  0x20   : > { %s182_s3 = sshll.u32 %s173_s29, 4  ;;  %s1635_s0 = sld [smem:[#allocation21_spill]]  ;;  %s1292_s3 = int_to_ptr.vmem [resolvable:$true] %s182_s3 }
  0x21   : > { %p1303_p9 = pnand %p1609_p8, %p1274_p5  ;;  %s1307_s29 = scalar_lea.sflag [#allocation4], %s169_s11 }
  0x23   : > { %p913_p11 = pneg %p1303_p9 }
  0x26   : > { %s1297_s2 = scalar_lea.hbm %s1635_s0, %s659_s23  ;;  %s916_s5 = scalar_lea.hbm %s1635_s0, 4096 }
  0x27   : > { %s911_s4 = scalar_lea.hbm %s1297_s2, 512  ;;  %p917_p1 = scmp.lt.u32.totalorder %s1297_s2, %s1635_s0 }
  0x28   : > { %p912_p10 = scmp.ne.s32.totalorder %s1297_s2, %s911_s4  ;;  %p918_p3 = scmp.lt.u32.totalorder %s916_s5, %s911_s4 }
  0x29   : > { %p920_p8 = scmp.lt.u32.totalorder %s911_s4, %s1297_s2 }
  0x2a   : > { %p914_p12 = pnand %p913_p11, %p912_p10  ;;  %p919_p5 = por %p918_p3, %p917_p1 }
  0x2c   : > { %p915_p13 = pneg %p914_p12  ;;  %p921_p2 = por %p920_p8, %p919_p5 }
  0x2e   : > { %p922_p7 = pnand %p921_p2, %p915_p13 }
  0x30   : > { %925 = shalt.err (!%p922_p7)
}
  0x31   : > { %s926_s11 = scalar_lea.vmem %s1292_s3, 512  ;;  %s1139_s28 = smov [#allocation3]  }
  0x32   : > { %p927_p10 = scmp.ne.s32.totalorder %s1292_s3, %s926_s11  ;;  %s931_s21 = sshll.u32 %s1139_s28, 4  ;;  %s932_s21 = int_to_ptr.vmem [resolvable:$false] %s931_s21 }
  0x33   : > { %s933_s23 = scalar_lea.vmem %s932_s21, 1024  ;;  %p934_p4 = scmp.lt.s32.totalorder %s1292_s3, %s932_s21 }
  0x34   : > { %p929_p12 = pnand %p927_p10, %p913_p11  ;;  %p935_p1 = scmp.lt.s32.totalorder %s933_s23, %s926_s11 }
  0x36   : > { %p930_p6 = pneg %p929_p12  ;;  %p936_p3 = por %p935_p1, %p934_p4 }
  0x38   : > { %p937_p8 = pnand %p936_p3, %p930_p6 }
  0x3a   : > { %940 = shalt.err (!%p937_p8)
}
  0x3b   : > { %s1140_s4 = smov 256   ;;  %s1613_s5 = smov 64  }
  0x3c   : > { %s1614_s8 = smov 4   ;;  %p664_p2 = scmp.ge.s32.totalorder %s1137_s27, 1 }
  0x3d   : > { %753 = dma.hbm_to_vmem [thread:$0]  (!%p1303_p9), %s1297_s2, 512, %s1292_s3, %s1307_s29, %s1140_s4, %s1613_s5, %s1614_s8  }
  0x3e   : > { %p219_p4 = scmp.lt.s32.totalorder %s1137_s27, 17  ;;  %s653_s11 = sadd.s32 4294967294, %s1137_s27  }
  0x3f   : > { %s37_s28 = sadd.s32 1, %s1129_s25  ;;  %s78_s21 = sadd.s32 1, %s1097_s17 }
  0x40   : > { %p1339_p6 = pnand %p664_p2, %p219_p4  ;;  %s1690_s28 = smov (!%p1250_p0, %s37_s28), %s1129_s25 }
  0x41   : > { %p85_p7 = scmp.ne.s32.totalorder %s1097_s17, %s1093_s16  ;;  %p91_p9 = scmp.ne.s32.totalorder %s1093_s16, %s1089_s15 }
  0x42   : > { %p39_p11 = scmp.ge.s32.totalorder %s1690_s28, 2  ;;  %s132_s2 = sadd.s32 1, %s1085_s14 }
  0x43   : > { %p1638_p13 = scmp.eq.s32.totalorder %s1137_s27, 0  ;;  %p1640_p10 = scmp.ne.s32.totalorder %s1631_s7, 0 }
  0x44   : > { %s1692_s28 = smov (%p39_p11, %s1690_s28), 0  ;;  %s1643_s30 = sadd.s32 1, %s1133_s26 }
  0x45   : > { %p1356_p5 = por %p85_p7, %p1638_p13  ;;  %p1362_p12 = por %p91_p9, %p1640_p10 }
  0x46   : > { %1642 = sst [smem:[#allocation17_spill]] %s1692_s28  ;;  %s1694_s30 = smov (!%p39_p11, %s1643_s30), %s1133_s26 }
  0x47   : > { %s1641_s22 = scalar_select %p1362_p12, 1, 0 }
  0x48   : > { %s74_s15 = ssub.s32 %s1129_s25, %s1692_s28  ;;  %p142_p0 = scmp.ne.s32.totalorder %s1085_s14, %s1081_s13 }
  0x49   : > { %p43_p1 = scmp.ge.s32.totalorder %s1694_s30, 2  ;;  %s75_s29 = sor.u32 %s74_s15, %s1266_s6 }
  0x4a   : > { %p76_p3 = scmp.eq.s32.totalorder %s75_s29, 0  ;;  %p1644_p8 = scmp.ne.s32.totalorder %s1633_s9, 0 }
  0x4b   : > { %s1696_s30 = smov (%p43_p1, %s1694_s30), 0  ;;  %p148_p4 = scmp.ne.s32.totalorder %s1081_s13, %s1077_s12 }
  0x4c   : > { %p1378_p2 = por %p1644_p8, %p142_p0  ;;  %1647 = sst [smem:[#allocation19_spill]] %s1696_s30 }
  0x4d   : > { %s1385_s23 = scalar_select %p76_p3, %s1097_s17, %s78_s21  }
  0x4e   : > { %s1645_s7 = scalar_select %p1378_p2, 1, 0 }
  0x4f   : > { %1648 = sst [smem:[#allocation20_spill]] %s1385_s23  ;;  %s45_s4 = ssub.s32 %s1133_s26, %s1696_s30 }
  0x50   : > { %1646 = sst [smem:[#allocation18_spill]] %s1645_s7  ;;  %s47_s5 = sor.u32 %s1266_s6, %s45_s4 }
  0x51   : > { %s129_s8 = sor.u32 %s74_s15, %s45_s4  ;;  %p48_p7 = scmp.eq.s32.totalorder %s47_s5, 0 }
  0x52   : > { %p130_p9 = scmp.eq.s32.totalorder %s129_s8, 0  ;;  %p149_p11 = scmp.eq.s32.totalorder %s653_s11, 15 }
  0x53   : > { %s192_s9 = sand.u32 1, %s1097_s17   ;;  %s1649_s29 = sadd.s32 1, %s1109_s20 }
  0x54   : > { %s1396_s0 = scalar_select %p48_p7, %s1109_s20, %s1649_s29  }
  0x55   : > { %s1399_s28 = scalar_select %p130_p9, %s1085_s14, %s132_s2  }
  0x56   : > { %p1401_p13 = por %p149_p11, %p148_p4  ;;  %s660_s21 = sshll.u32 %s192_s9, 6 }
  0x57   : > { %s690_s30 = sshll.u32 %s1125_s24, 5  ;;  %s196_s15 = scalar_lea.vmem [#allocation6], %s660_s21 }
  0x58   : > { %s1650_s7 = scalar_select %p1401_p13, 1, 0 }
  0x59   : > { %s202_s26 = sadd.s32 %s1129_s25, %s690_s30  ;;  %s205_s4 = sshll.u32 %s196_s15, 4  ;;  %s1412_s4 = int_to_ptr.vmem [resolvable:$true] %s205_s4 }
  0x5a   : > { %s663_s6 = sshll.u32 %s202_s26, 6  ;;  %p1651_p10 = scmp.lt.s32.totalorder %s1137_s27, 16 }
  0x5b   : > { %s1410_s8 = scalar_lea.hbm %s1603_s1, %s663_s6  ;;  %s1422_s26 = scalar_lea.sflag [#allocation7], %s192_s9 }
  0x5c   : > { %p1418_p0 = pnand %p1651_p10, %p1356_p5  ;;  %s941_s2 = scalar_lea.hbm %s1410_s8, 1024 }
  0x5d   : > { %p942_p1 = scmp.ne.s32.totalorder %s1410_s8, %s941_s2  ;;  %s946_s3 = scalar_lea.hbm %s1603_s1, 8192 }
  0x5e   : > { %p943_p3 = pneg %p1418_p0  ;;  %p947_p5 = scmp.lt.u32.totalorder %s1410_s8, %s1603_s1 }
  0x5f   : > { %p948_p7 = scmp.lt.u32.totalorder %s946_s3, %s941_s2  ;;  %p950_p11 = scmp.lt.u32.totalorder %s941_s2, %s1410_s8 }
  0x60   : > { %p944_p8 = pnand %p943_p3, %p942_p1 }
  0x61   : > { %p949_p9 = por %p948_p7, %p947_p5 }
  0x62   : > { %p945_p4 = pneg %p944_p8 }
  0x63   : > { %p951_p10 = por %p950_p11, %p949_p9 }
  0x65   : > { %p952_p13 = pnand %p951_p10, %p945_p4 }
  0x67   : > { %955 = shalt.err (!%p952_p13)
}
  0x68   : > { %s956_s9 = scalar_lea.vmem %s1412_s4, 1024  ;;  %s1143_s6 = smov [#allocation6]  }
  0x69   : > { %p957_p1 = scmp.ne.s32.totalorder %s1412_s4, %s956_s9  ;;  %s961_s15 = sshll.u32 %s1143_s6, 4  ;;  %s962_s15 = int_to_ptr.vmem [resolvable:$false] %s961_s15 }
  0x6a   : > { %s963_s5 = scalar_lea.vmem %s962_s15, 2048  ;;  %p964_p12 = scmp.lt.s32.totalorder %s1412_s4, %s962_s15 }
  0x6b   : > { %p959_p8 = pnand %p957_p1, %p943_p3  ;;  %p965_p5 = scmp.lt.s32.totalorder %s963_s5, %s956_s9 }
  0x6d   : > { %p960_p2 = pneg %p959_p8  ;;  %p966_p7 = por %p965_p5, %p964_p12 }
  0x6f   : > { %p967_p9 = pnand %p966_p7, %p960_p2 }
  0x71   : > { %970 = shalt.err (!%p967_p9)
}
  0x72   : > { %s1144_s2 = smov 128   ;;  %s1653_s30 = smov 4  }
  0x73   : > { %s1654_s23 = smov 64   ;;  %223 = sbr.rel (%p1339_p6) target bundleno = 436 (0x1b4), region = 32 }
  0x74   : > { %756 = dma.hbm_to_vmem [thread:$0]  (!%p1418_p0), %s1410_s8, 1024, %s1412_s4, %s1422_s26, %s1144_s2, %s1654_s23, %s1653_s30  }
  0x75   : > { %s225_s3 = sand.u32 (!%p1339_p6), 1, %s1105_s19   ;;  %p1655_p12 = scmp.ne.s32.totalorder (!%p1339_p6), %s1634_s10, 0 }
  0x76   : > { %s665_s29 = sshll.u32 (!%p1339_p6), %s225_s3, 5  ;;  %s226_s21 = scalar_lea.sflag (!%p1339_p6), [#allocation4], %s225_s3 }
  0x77   : > { %s1455_s9 = scalar_lea.vmem (!%p1339_p6), [#allocation3], %s665_s29 }
  0x7a   : > { %1064 = dma.done.wait (%p1655_p12), %s226_s21, 512  }
  0x7b   : > { %1066 = vsyncadd (%p1655_p12), %s226_s21, 4294966784  ;;  %s234_s11 = sand.u32 1, %s1093_s16   ;;  %p1656_p6 = scmp.ne.s32.totalorder %s1641_s22, 0 }
  0x7c   : > { %s666_s6 = sshll.u32 %s234_s11, 6  ;;  %s235_s4 = scalar_lea.sflag [#allocation7], %s234_s11 }
  0x7d   : > { %s1462_s8 = scalar_lea.vmem [#allocation6], %s666_s6 }
  0x7e   : > { %1068 = dma.done.wait (%p1656_p6), %s235_s4, 1024  }
  0x7f   : > { %1070 = vsyncadd (%p1656_p6), %s235_s4, 4294966272  ;;  %s1657_s18 = sld [smem:[#allocation13_spill]]  ;;  %s266_s26 = sand.u32 1, %s1081_s13  }
  0x80   : > { %s667_s10 = sshll.u32 %s266_s26, 6  ;;  %s1658_s2 = sld [smem:[#allocation22_spill]] }
  0x81   : > { %s1479_s23 = scalar_lea.vmem [#allocation8], %s667_s10  ;;  %s1659_s3 = sld [smem:[#allocation12_spill]] }
  0x85   : > { %p271_p2 = scmp.lt.s32.totalorder %s1657_s18, 1 }
  0x87   : > { %s1698_s18 = smov (!%p271_p2, %s1657_s18), 1  ;;  %p668_p13 = scmp.ne.s32.totalorder %s1659_s3, 0 }
  0x88   : > { %s273_s30 = scalar_lea.vmem %s1658_s2, %s1698_s18  ;;  %v1145_v0 = vmov (!%p668_p13), 0.0  }
  0x89   : > { %279 = sbr.rel (%p668_p13) target bundleno = 144 (0x90), region = 44  ;;  %280 = vst [vmem:[#allocation2] sm:$0xff] (!%p668_p13), %v1145_v0  ;;  %281 = vst [vmem:[#allocation2 + $0x8] sm:$0xff] (!%p668_p13), %v1145_v0 }
  0x8a   : > { %282 = vst [vmem:[#allocation2 + $0x10] sm:$0xff] (!%p668_p13), %v1145_v0  ;;  %283 = vst [vmem:[#allocation2 + $0x18] sm:$0xff] (!%p668_p13), %v1145_v0 }
  0x8b   : > { %284 = vst [vmem:[#allocation2 + $0x20] sm:$0xff] (!%p668_p13), %v1145_v0  ;;  %285 = vst [vmem:[#allocation2 + $0x28] sm:$0xff] (!%p668_p13), %v1145_v0 }
  0x8c   : > { %286 = vst [vmem:[#allocation2 + $0x30] sm:$0xff] (!%p668_p13), %v1145_v0  ;;  %287 = vst [vmem:[#allocation2 + $0x38] sm:$0xff] (!%p668_p13), %v1145_v0 }
  0x90 PF: > { %v899_v1 = vld [vmem:[%s1462_s8] sm:$0xff]   ;;  %v900_v2 = vld [vmem:[%s1462_s8 + $0x8] sm:$0xff]   ;;  %v901_v3 = vld [vmem:[%s1462_s8 + $0x10] sm:$0xff]   ;;  %s1660_s22 = sld [smem:[#allocation12_spill]] }
  0x91   : > { %704 = vmatprep.subr.bf16.mxu0 %v899_v1  ;;  %728 = vmatprep.subr.bf16.mxu1 %v899_v1  ;;  %v902_v4 = vld [vmem:[%s1462_s8 + $0x18] sm:$0xff]   ;;  %v907_v5 = vld [vmem:[%s1455_s9] sm:$0xff]   ;;  %v908_v6 = vld [vmem:[%s1455_s9 + $0x10] sm:$0xff]  }
  0x92   : > { %705 = vmatpush3.bf16.msra.mxu0 %v899_v1  ;;  %736 = vmatpush3.bf16.msra.mxu1 %v899_v1  ;;  %v903_v7 = vld [vmem:[%s1462_s8 + $0x20] sm:$0xff]   ;;  %v904_v8 = vld [vmem:[%s1462_s8 + $0x28] sm:$0xff]   ;;  %v905_v9 = vld [vmem:[%s1462_s8 + $0x30] sm:$0xff]  }
  0x93   : > { %706 = vmatprep.subr.bf16.mxu0 %v900_v2  ;;  %729 = vmatprep.subr.bf16.mxu1 %v900_v2  ;;  %v906_v10 = vld [vmem:[%s1462_s8 + $0x38] sm:$0xff]   ;;  %v909_v11 = vld [vmem:[%s1455_s9 + $0x8] sm:$0xff]   ;;  %v290_v13 = vld [vmem:[#allocation2 + $0x10] sm:$0xff] }
  0x94   : > { %720 = vmatprep.mubr.bf16.mxu0 %v907_v5  ;;  %724 = vmatprep.mubr.bf16.mxu1 %v908_v6  ;;  %v910_v12 = vld [vmem:[%s1455_s9 + $0x18] sm:$0xff]   ;;  %v294_v14 = vld [vmem:[#allocation2 + $0x30] sm:$0xff]  ;;  %v288_v15 = vld [vmem:[#allocation2] sm:$0xff] }
  0x95   : > { %v292_v16 = vld [vmem:[#allocation2 + $0x20] sm:$0xff]  ;;  %v291_v19 = vld [vmem:[#allocation2 + $0x18] sm:$0xff]  ;;  %v289_v25 = vld [vmem:[#allocation2 + $0x8] sm:$0xff] }
  0x96   : > { %707 = vmatpush3.bf16.msra.mxu0 %v900_v2  ;;  %737 = vmatpush3.bf16.msra.mxu1 %v900_v2  ;;  %v295_v20 = vld [vmem:[#allocation2 + $0x38] sm:$0xff]  ;;  %v293_v26 = vld [vmem:[#allocation2 + $0x28] sm:$0xff]  ;;  %p681_p0 = scmp.ne.s32.totalorder %s1660_s22, 3 }
  0x97   : > { %708 = vmatprep.subr.bf16.mxu0 %v901_v3  ;;  %730 = vmatprep.subr.bf16.mxu1 %v901_v3  ;;  %v682_v38 = vld [vmem:[%s273_s30] ss:$0 sm:$0xff] (!%p681_p0) }
  0x9a   : > { %709 = vmatpush3.bf16.msra.mxu0 %v901_v3  ;;  %738 = vmatpush3.bf16.msra.mxu1 %v901_v3 }
  0x9b   : > { %710 = vmatprep.subr.bf16.mxu0 %v902_v4  ;;  %731 = vmatprep.subr.bf16.mxu1 %v902_v4 }
  0x9e   : > { %711 = vmatpush3.bf16.msra.mxu0 %v902_v4  ;;  %739 = vmatpush3.bf16.msra.mxu1 %v902_v4 }
  0x9f   : > { %712 = vmatprep.subr.bf16.mxu0 %v903_v7  ;;  %732 = vmatprep.subr.bf16.mxu1 %v903_v7 }
  0xa2   : > { %713 = vmatpush3.bf16.msra.mxu0 %v903_v7  ;;  %740 = vmatpush3.bf16.msra.mxu1 %v903_v7 }
  0xa3   : > { %714 = vmatprep.subr.bf16.mxu0 %v904_v8  ;;  %733 = vmatprep.subr.bf16.mxu1 %v904_v8 }
  0xa6   : > { %715 = vmatpush3.bf16.msra.mxu0 %v904_v8  ;;  %741 = vmatpush3.bf16.msra.mxu1 %v904_v8 }
  0xa7   : > { %716 = vmatprep.subr.bf16.mxu0 %v905_v9  ;;  %734 = vmatprep.subr.bf16.mxu1 %v905_v9 }
  0xaa   : > { %717 = vmatpush3.bf16.msra.mxu0 %v905_v9  ;;  %742 = vmatpush3.bf16.msra.mxu1 %v905_v9 }
  0xab   : > { %718 = vmatprep.subr.bf16.mxu0 %v906_v10  ;;  %735 = vmatprep.subr.bf16.mxu1 %v906_v10 }
  0xae   : > { %719 = vmatpush3.bf16.msra.mxu0 %v906_v10  ;;  %743 = vmatpush3.bf16.msra.mxu1 %v906_v10 }
  0xb1   : > { %721 = vmatmul.mubr.bf16.vlgmr.msra.gmra.mrb[0].mxu0 %v909_v11  ;;  %725 = vmatmul.mubr.bf16.vlgmr.msra.gmra.mrb[0].mxu1 %v910_v12 }
 0x184   : > { %v722_v17 = vpop.f32.mrb[0].mxu0  ;;  %v726_v18 = vpop.f32.mrb[0].mxu1  ;;  %476 = sbr.rel (%p681_p0) target bundleno = 406 (0x196), region = 48 }
 0x185   : > { %v459_v21 = vadd.f32 %v722_v17, %v290_v13  ;;  %v463_v22 = vadd.f32 %v726_v18, %v294_v14  ;;  %v426_v23 = vpop.f32.mrb[1].mxu0  ;;  %v442_v24 = vpop.f32.mrb[1].mxu1 }
 0x186   : > { %v457_v27 = vadd.f32 %v426_v23, %v288_v15  ;;  %v461_v28 = vadd.f32 %v442_v24, %v292_v16  ;;  %v723_v29 = vpop.f32.mrb[2].mxu0  ;;  %v727_v30 = vpop.f32.mrb[2].mxu1 }
 0x187   : > { %467 = vst [vmem:[#allocation2 + $0x10] sm:$0xff] %v459_v21  ;;  %471 = vst [vmem:[#allocation2 + $0x30] sm:$0xff] %v463_v22  ;;  %v460_v31 = vadd.f32 %v723_v29, %v291_v19  ;;  %v464_v32 = vadd.f32 %v727_v30, %v295_v20  ;;  %v429_v33 = vpop.f32.mrb[3].mxu0  ;;  %v445_v34 = vpop.f32.mrb[3].mxu1 }
 0x188   : > { %465 = vst [vmem:[#allocation2] sm:$0xff] %v457_v27  ;;  %469 = vst [vmem:[#allocation2 + $0x20] sm:$0xff] %v461_v28  ;;  %v458_v35 = vadd.f32 %v429_v33, %v289_v25  ;;  %v462_v36 = vadd.f32 %v445_v34, %v293_v26 }
 0x189   : > { %468 = vst [vmem:[#allocation2 + $0x18] sm:$0xff] %v460_v31  ;;  %472 = vst [vmem:[#allocation2 + $0x38] sm:$0xff] %v464_v32 }
 0x18a   : > { %466 = vst [vmem:[#allocation2 + $0x8] sm:$0xff] %v458_v35  ;;  %470 = vst [vmem:[#allocation2 + $0x28] sm:$0xff] %v462_v36 }
 0x18e   : > { %v479_v42 = vld [vmem:[#allocation2 + $0x10] sm:$0xff] }
 0x18f   : > { %v477_v37 = vld [vmem:[#allocation2] sm:$0xff]  ;;  %v494_v45 = vadd.f32 %v682_v38, %v479_v42  ;;  %v483_v49 = vld [vmem:[#allocation2 + $0x30] sm:$0xff] }
 0x190   : > { %v492_v40 = vadd.f32 %v682_v38, %v477_v37  ;;  %v480_v43 = vld [vmem:[#allocation2 + $0x18] sm:$0xff]  ;;  %v481_v44 = vld [vmem:[#allocation2 + $0x20] sm:$0xff]  ;;  %v498_v52 = vadd.f32 %v682_v38, %v483_v49 }
 0x191   : > { %v478_v39 = vld [vmem:[#allocation2 + $0x8] sm:$0xff]  ;;  %v495_v46 = vadd.f32 %v682_v38, %v480_v43  ;;  %v496_v47 = vadd.f32 %v682_v38, %v481_v44  ;;  %v484_v50 = vld [vmem:[#allocation2 + $0x38] sm:$0xff]  ;;  %502 = vst [vmem:[%s1479_s23 + $0x10] sm:$0xff] %v494_v45 }
 0x192   : > { %v493_v41 = vadd.f32 %v682_v38, %v478_v39  ;;  %v482_v48 = vld [vmem:[#allocation2 + $0x28] sm:$0xff]  ;;  %500 = vst [vmem:[%s1479_s23] sm:$0xff] %v492_v40  ;;  %v499_v53 = vadd.f32 %v682_v38, %v484_v50  ;;  %506 = vst [vmem:[%s1479_s23 + $0x30] sm:$0xff] %v498_v52 }
 0x193   : > { %v497_v51 = vadd.f32 %v682_v38, %v482_v48  ;;  %503 = vst [vmem:[%s1479_s23 + $0x18] sm:$0xff] %v495_v46  ;;  %504 = vst [vmem:[%s1479_s23 + $0x20] sm:$0xff] %v496_v47 }
 0x194   : > { %501 = vst [vmem:[%s1479_s23 + $0x8] sm:$0xff] %v493_v41  ;;  %507 = vst [vmem:[%s1479_s23 + $0x38] sm:$0xff] %v499_v53 }
 0x195   : > { %505 = vst [vmem:[%s1479_s23 + $0x28] sm:$0xff] %v497_v51 }
 0x196 PF: > { %s1662_s11 = sld [smem:[#allocation14_spill]]  ;;  %s1663_s6 = sld [smem:[#allocation13_spill]] }
 0x197   : > { %s1664_s4 = sld [smem:[#allocation18_spill]]  ;;  %s524_s10 = sshll.u32 %s1479_s23, 4  ;;  %s1511_s10 = int_to_ptr.vmem [resolvable:$true] %s524_s10 }
 0x198   : > { %s1665_s30 = sld [smem:[#allocation23_spill]]  ;;  %s1520_s22 = scalar_lea.sflag [#allocation5], %s266_s26 }
 0x199   : > { %s971_s29 = scalar_lea.vmem %s1511_s10, 1024  ;;  %s1146_s23 = smov [#allocation8]  }
 0x19a   : > { %p972_p3 = scmp.ne.s32.totalorder %s1511_s10, %s971_s29  ;;  %s975_s21 = sshll.u32 %s1146_s23, 4  ;;  %s976_s21 = int_to_ptr.vmem [resolvable:$false] %s975_s21 }
 0x19b   : > { %s977_s9 = scalar_lea.vmem %s976_s21, 2048  ;;  %p978_p1 = scmp.lt.s32.totalorder %s1511_s10, %s976_s21 }
 0x19c   : > { %s691_s8 = sshll.u32 %s1662_s11, 4  ;;  %p979_p8 = scmp.lt.s32.totalorder %s977_s9, %s971_s29 }
 0x19d   : > { %s521_s18 = sadd.s32 %s1663_s6, %s691_s8  ;;  %p1666_p4 = scmp.ne.s32.totalorder %s1664_s4, 0 }
 0x19e   : > { %s686_s15 = sshll.u32 %s521_s18, 7  ;;  %p980_p5 = por %p979_p8, %p978_p1 }
 0x19f   : > { %s1516_s3 = scalar_lea.hbm %s1665_s30, %s686_s15  ;;  %p973_p11 = pnand %p972_p3, %p1666_p4 }
 0x1a1   : > { %p974_p10 = pneg %p973_p11 }
 0x1a3   : > { %p981_p7 = pnand %p980_p5, %p974_p10 }
 0x1a5   : > { %984 = shalt.err (!%p981_p7)
}
 0x1a6   : > { %s985_s26 = scalar_lea.hbm %s1516_s3, 1024  ;;  %s989_s8 = scalar_lea.hbm %s1665_s30, 4096 }
 0x1a7   : > { %p986_p9 = scmp.ne.s32.totalorder %s1516_s3, %s985_s26  ;;  %p990_p2 = scmp.lt.u32.totalorder %s1516_s3, %s1665_s30 }
 0x1a8   : > { %p991_p13 = scmp.lt.u32.totalorder %s989_s8, %s985_s26  ;;  %p993_p3 = scmp.lt.u32.totalorder %s985_s26, %s1516_s3 }
 0x1a9   : > { %p987_p12 = pnand %p986_p9, %p1666_p4 }
 0x1aa   : > { %p992_p0 = por %p991_p13, %p990_p2 }
 0x1ab   : > { %p988_p6 = pneg %p987_p12 }
 0x1ac   : > { %p994_p11 = por %p993_p3, %p992_p0 }
 0x1ae   : > { %p995_p10 = pnand %p994_p11, %p988_p6 }
 0x1b0   : > { %998 = shalt.err (!%p995_p10)
}
 0x1b1   : > { %s1147_s5 = smov 128   ;;  %s1148_s2 = smov 256  }
 0x1b2   : > { %s1149_s29 = smov 8  }
 0x1b3   : > { %748 = dma.vmem_to_hbm [thread:$0]  (%p1666_p4), %s1511_s10, 1024, %s1516_s3, %s1520_s22, %s1147_s5, %s1148_s2, %s1149_s29  }
 0x1b4 PF: > { %p762_p1 = scmp.ge.s32.totalorder %s1137_s27, 2  ;;  %s539_s23 = sand.u32 1, %s1077_s12  }
 0x1b5   : > { %p1667_p8 = scmp.ne.s32.totalorder %s1650_s7, 0  ;;  %s540_s21 = scalar_lea.sflag [#allocation5], %s539_s23 }
 0x1b7   : > { %p758_p5 = pnand %p762_p1, %p1667_p8 }
 0x1b9   : > { %1072 = dma.done.wait (!%p758_p5), %s540_s21, 1024  }
 0x1ba   : > { %1074 = vsyncadd (!%p758_p5), %s540_s21, 4294966272  ;;  %s22_s27 = sadd.s32 1, %s1137_s27   ;;  %s1669_s4 = sld [smem:[#allocation20_spill]] }
 0x1bb   : > { %p1549_p7 = scmp.ge.s32.totalorder %s22_s27, 18   ;;  %s1670_s23 = sld [smem:[#allocation15_spill]] }
 0x1bc   : > { %s1671_s7 = sld [smem:[#allocation16_spill]]  ;;  %s1672_s10 = sld [smem:[#allocation17_spill]] }
 0x1bd   : > { %s1673_s26 = sld [smem:[#allocation19_spill]]  ;;  %s1674_s12 = smov %s1081_s13 }
 0x1be   : > { %s1675_s13 = smov %s1085_s14  ;;  %s1676_s14 = smov %s1399_s28 }
 0x1bf   : > { %s1677_s15 = smov %s1093_s16  ;;  %s1678_s16 = smov %s1097_s17 }
 0x1c0   : > { %s1679_s17 = smov %s1669_s4  ;;  %s1680_s18 = smov %s1105_s19 }
 0x1c1   : > { %s1681_s19 = smov %s1109_s20  ;;  %s1682_s20 = smov %s1396_s0 }
 0x1c2   : > { %s1683_s21 = smov %s1125_s24  ;;  %s1684_s22 = smov %s1129_s25 }
 0x1c3   : > { %s1685_s24 = smov %s1671_s7  ;;  %s1686_s25 = smov %s1672_s10 }
 0x1c4   :  { %21 = sbr.rel (!%p1549_p7) target bundleno = 17 (0x11), region = 101 }
 0x1cb   :  { %545 = vsyncpa [#allocation4], 1 }
 0x1cc   :  { %547 = vsyncpa [#allocation4 + $0x1], 1 }
 0x1cd   :  { %548 = vsyncpa [#allocation7], 1 }
 0x1ce   :  { %550 = vsyncpa [#allocation7 + $0x1], 1 }
 0x1cf   :  { %551 = vsyncpa [#allocation5], 1 }
 0x1d0   :  { %553 = vsyncpa [#allocation5 + $0x1], 1 }

</bundles_post_ra>
